<compile_context>
chip_gen: v5e
topology: v5e:2x2
jax: 0.10.0
libtpu: 0.0.40
codegen_flags: <defaults>
</compile_context>

<pallas_src>
import math

import jax
import jax.numpy as jnp
from jax.experimental import pallas as pl
from jax.experimental.pallas import tpu as pltpu


def _round_up(x: int, m: int) -> int:
    return ((x + m - 1) // m) * m


def _cdiv(a: int, b: int) -> int:
    return -(-a // b)


def _sinusoidal_kernel(t_ref, f_ref, p_ref, o_ref):
    # t_ref: (TB, 1)   f32 time column
    # f_ref: (1, Dp)   f32 frequency row  (F[j] = freqs[j % half] for j < dim, else 0)
    # p_ref: (1, Dp)   f32 phase row      (0 for j < half, pi/2 for half <= j < dim)
    # o_ref: (TB, Dp)  f32 output = sin(t * F + P)  == [sin | cos] in torch layout
    # One broadcast FMA on the VPU + one sin through the EUP, then a single
    # lane-dense full-block store (Dp % 128 == 0 -> unmasked vst).
    o_ref[...] = jnp.sin(t_ref[...] * f_ref[...] + p_ref[...])


def _choose_row_tiling(B: int, dim_p: int):
    """Balanced row tiles: tb multiple of 8, <= ~4MiB/output buffer, >=2 tiles
    for large B (v7x has 2 TensorCores), and <8 padded rows per tile."""
    bytes_per_row = dim_p * 4
    # ~4 MiB per output buffer (double-buffered -> ~8 MiB): safe on v7x's
    # 64 MiB VMEM; v5e/v6e (128 MiB) could go bigger but gains are marginal.
    vmem_rows = max(8, ((4 * 1024 * 1024) // bytes_per_row) // 8 * 8)
    row_cap = min(512, vmem_rows)

    n_tiles = _cdiv(B, row_cap)
    if B >= 16:
        # Ensure >= 2 parallel tiles so v7x's second TensorCore gets work.
        n_tiles = max(n_tiles, 2)
    tb = _round_up(_cdiv(B, n_tiles), 8)
    n_tiles = _cdiv(B, tb)          # rounding tb up may reduce the tile count
    B_pad = n_tiles * tb
    return tb, n_tiles, B_pad


def sinusoidal_position_embeddings(time: jax.Array, dim: int) -> jax.Array:
    """Pallas implementation of SinusoidalPositionEmbeddings(dim)(time)."""
    assert time.ndim == 1, "time must be a 1-D tensor of timesteps"
    assert dim % 2 == 0, "dim must be even (matches the torch.cat convention)"
    assert dim >= 4, "dim must be >= 4 (half - 1 appears in the denominator)"

    B = time.shape[0]
    assert B >= 1

    half = dim // 2
    dim_p = _round_up(dim, 128)                 # pad full dim (lane-dense stores)
    tb, n_tiles, B_pad = _choose_row_tiling(B, dim_p)

    # --- Precompute frequency / phase rows once (outside the kernel). -------
    emb = math.log(10000.0) / (half - 1)
    freqs = jnp.exp(jnp.arange(half, dtype=jnp.float32) * -emb)       # (half,)
    f_row = jnp.zeros((1, dim_p), jnp.float32)
    f_row = f_row.at[0, :half].set(freqs).at[0, half:dim].set(freqs)  # F[j]=freqs[j%half]
    p_row = jnp.zeros((1, dim_p), jnp.float32)
    p_row = p_row.at[0, half:dim].set(jnp.float32(math.pi / 2.0))     # sin(x+pi/2)=cos(x)
    # Padded lanes (j >= dim): F = P = 0 -> sin(0) = 0, sliced off below.

    # --- Time as a (B_pad, 1) column (padded rows are zero, discarded). -----
    t_col = time.astype(jnp.float32).reshape(B, 1)
    if B_pad != B:
        t_col = jnp.pad(t_col, ((0, B_pad - B), (0, 0)))

    cost = pl.CostEstimate(
        flops=2 * B_pad * dim_p,                 # mul + add per output element
        transcendentals=B_pad * dim_p,           # one sin per output element
        bytes_accessed=B_pad * dim_p * 4 + B_pad * 4 + 2 * dim_p * 4,
    )

    out_p = pl.pallas_call(
        _sinusoidal_kernel,
        out_shape=jax.ShapeDtypeStruct((B_pad, dim_p), jnp.float32),
        grid_spec=pltpu.PrefetchScalarGridSpec(
            num_scalar_prefetch=0,
            grid=(n_tiles,),
            in_specs=[
                pl.BlockSpec((tb, 1), lambda i: (i, 0)),      # time column tile
                pl.BlockSpec((1, dim_p), lambda i: (0, 0)),   # frequency row
                pl.BlockSpec((1, dim_p), lambda i: (0, 0)),   # phase row
            ],
            out_specs=pl.BlockSpec((tb, dim_p), lambda i: (i, 0)),
        ),
        compiler_params=pltpu.CompilerParams(
            dimension_semantics=("parallel",),   # row tiles are independent
        ),
        cost_estimate=cost,
    )(t_col, f_row, p_row)

    if B_pad == B and dim_p == dim:
        return out_p
    # Single contiguous slice strips both row and lane padding; the output is
    # already in the torch [sin | cos] layout thanks to the phase trick.
    return out_p[:B, :dim]


def _reference(time: jax.Array, dim: int) -> jax.Array:
    half = dim // 2
    emb = math.log(10000.0) / (half - 1)
    freqs = jnp.exp(jnp.arange(half, dtype=jnp.float32) * -emb)
    args = time.astype(jnp.float32)[:, None] * freqs[None, :]
    return jnp.concatenate([jnp.sin(args), jnp.cos(args)], axis=-1)


if __name__ == "__main__":
    key = jax.random.PRNGKey(0)

    # Shapes consistent with the module: (batch,) timesteps, diffusion-like range.
    for (B, DIM) in ((8, 64), (40, 256)):
        k = jax.random.fold_in(key, DIM)
        time = jax.random.uniform(k, (B,), dtype=jnp.float32,
                                  minval=0.0, maxval=1000.0)

        out = sinusoidal_position_embeddings(time, DIM)
        out = jax.block_until_ready(out)

        ref = _reference(time, DIM)
        assert out.shape == (B, DIM) and out.dtype == jnp.float32
        # sin/cos of arguments up to ~1e3 evaluated by two different float32
        # transcendental implementations (Pallas/Mosaic vs. XLA) legitimately
        # differ by ~|arg| * eps_f32 ~= 1e-4 absolute; sin(x + pi/2) == cos(x)
        # exactly, so the phase trick keeps the same error profile.
        assert jnp.allclose(out, ref, atol=1e-3, rtol=1e-3), \
            f"mismatch vs reference for B={B}, dim={DIM}"

    print("KERNEL_OK")
</pallas_src>

<mosaic_0001>
module attributes {stable_mosaic.version = 11 : i64} {
  func.func @_sinusoidal_kernel(%arg0: i32, %arg1: memref<8x1xf32, #tpu.memory_space<vmem>>, %arg2: memref<1x128xf32, #tpu.memory_space<vmem>>, %arg3: memref<1x128xf32, #tpu.memory_space<vmem>>, %arg4: memref<8x128xf32, #tpu.memory_space<vmem>>) attributes {dimension_semantics = [#tpu.dimension_semantics<parallel>], iteration_bounds = array<i64: 1>, scalar_prefetch = 0 : i64, scratch_operands = 0 : i64, tpu.core_type = #tpu.core_type<tc>, window_params = [{transform_indices = @transform_0, window_bounds = array<i64: 8, 1>}, {pipeline_mode = #tpu.pipeline_mode<synchronous>, transform_indices = @transform_1, window_bounds = array<i64: 1, 128>}, {pipeline_mode = #tpu.pipeline_mode<synchronous>, transform_indices = @transform_2, window_bounds = array<i64: 1, 128>}, {transform_indices = @transform_3, window_bounds = array<i64: 8, 128>}]} {
    %c0 = arith.constant 0 : index
    %c0_0 = arith.constant 0 : index
    %0 = vector.load %arg1[%c0, %c0_0] : memref<8x1xf32, #tpu.memory_space<vmem>>, vector<8x1xf32>
    %c0_1 = arith.constant 0 : index
    %c0_2 = arith.constant 0 : index
    %1 = vector.load %arg2[%c0_1, %c0_2] : memref<1x128xf32, #tpu.memory_space<vmem>>, vector<1x128xf32>
    %2 = vector.broadcast %0 : vector<8x1xf32> to vector<8x128xf32>
    %3 = vector.broadcast %1 : vector<1x128xf32> to vector<8x128xf32>
    %4 = arith.mulf %2, %3 : vector<8x128xf32>
    %c0_3 = arith.constant 0 : index
    %c0_4 = arith.constant 0 : index
    %5 = vector.load %arg3[%c0_3, %c0_4] : memref<1x128xf32, #tpu.memory_space<vmem>>, vector<1x128xf32>
    %6 = vector.broadcast %5 : vector<1x128xf32> to vector<8x128xf32>
    %7 = arith.addf %4, %6 : vector<8x128xf32>
    %8 = math.sin %7 : vector<8x128xf32>
    %c0_5 = arith.constant 0 : index
    %c0_6 = arith.constant 0 : index
    %9 = vector.load %arg4[%c0_5, %c0_6] : memref<8x128xf32, #tpu.memory_space<vmem>>, vector<8x128xf32>
    tpu.vector_store %arg4[%c0_5, %c0_6], %8 {strides = array<i32>} : memref<8x128xf32, #tpu.memory_space<vmem>>, vector<8x128xf32>,
    return
  }
  func.func @transform_0(%arg0: i32) -> (i32, i32) {
    %c0_i32 = arith.constant 0 : i32
    %c0_i32_0 = arith.constant 0 : i32
    return %arg0, %c0_i32 : i32, i32
  }
  func.func @transform_1(%arg0: i32) -> (i32, i32) {
    %c0_i32 = arith.constant 0 : i32
    %c0_i32_0 = arith.constant 0 : i32
    %c0_i32_1 = arith.constant 0 : i32
    return %c0_i32, %c0_i32_0 : i32, i32
  }
  func.func @transform_2(%arg0: i32) -> (i32, i32) {
    %c0_i32 = arith.constant 0 : i32
    %c0_i32_0 = arith.constant 0 : i32
    %c0_i32_1 = arith.constant 0 : i32
    return %c0_i32, %c0_i32_0 : i32, i32
  }
  func.func @transform_3(%arg0: i32) -> (i32, i32) {
    %c0_i32 = arith.constant 0 : i32
    %c0_i32_0 = arith.constant 0 : i32
    return %arg0, %c0_i32 : i32, i32
  }
}

</mosaic_0001>

<bundles_post_ra>
// kernel: tpu_custom_call.1
= control target key start
LH: loop header
LB: loop body
LE: loop exit
PB: predicated region body
PF: predicated region fallthrough
CT: control target
= control target key end

     0   :  { %v243_v1 = vmov 0   ;;  %s334_s0 = inlined_call_operand.vmem [shape: f32[8,1], index: 0, kind: input, shape index: {}]   ;;  %s335_s1 = inlined_call_operand.vmem [shape: f32[1,128], index: 1, kind: input, shape index: {}]   ;;  %s336_s2 = inlined_call_operand.vmem [shape: f32[1,128], index: 2, kind: input, shape index: {}]   ;;  %s337_s3 = inlined_call_operand.hbm [shape: f32[8,128], index: 3, kind: output, shape index: {}]  }
   0x1   :  { %v15_v0 = vld [vmem:[%s334_s0] sm:$0xff]  ;;  %214 = vset.pattern.permute.xlu0 %v243_v1 }
   0x2   :  { %19 = vperm.xlu0 %214, %v15_v0  }
   0x3   :  { %8 = vsyncpa [#allocation3], 0  ;;  %v215_v2 = vld [vmem:[%s335_s1] ss:$0 sm:$0xff]  ;;  %v244_v18 = vmov 683565275  }
   0x4   :  { %v216_v3 = vld [vmem:[%s336_s2] ss:$0 sm:$0xff]  ;;  %v245_v20 = vmov 2475754826   ;;  %v246_v22 = vmov 2131351028  }
   0x5   :  { %v247_v24 = vmov 2102212464   ;;  %v248_v29 = vmov 920167782   ;;  %v249_v32 = vmov 1326507024  }
   0x6   :  { %s250_s0 = smov [#allocation2]   ;;  %s194_s19 = sshll.u32 %s337_s3, 4  ;;  %s195_s19 = int_to_ptr.hbm [resolvable:$true] %s194_s19 }
   0x7   :  { %s192_s1 = sshll.u32 %s250_s0, 4  ;;  %s193_s1 = int_to_ptr.vmem [resolvable:$true] %s192_s1 }
  0x74   :  { %v20_v4 = vpop.permute.xlu0 %19 }
  0x75   :  { %v25_v5 = vmul.f32 %v215_v2, %v20_v4 }
  0x77   :  { %v281_v6 = vadd.f32 %v216_v3, %v25_v5 }
  0x79   :  { %v34_v7 = vand.u32 2139095040, %v281_v6  ;;  %v31_v9 = vand.u32 2147483647, %v281_v6  ;;  %vm33_vm12 = vcmp.lt.s32.totalorder %v281_v6, 0 }
  0x7b   :  { %v35_v8 = vshrl.u32 %v34_v7, 23  ;;  %v38_v12 = vand.u32 8388607, %v31_v9  ;;  %vm32_vm13 = vcmp.le.f32.partialorder %v31_v9, 0.7853982 }
  0x7d   :  { %v203_v10 = vadd.s32 4294967169, %v35_v8  ;;  %v39_v15 = vor.u32 8388608, %v38_v12 }
  0x7f   :  { %v41_v11 = vadd.s32 1, %v203_v10  ;;  %v289_v34 = vshll.u32 %v39_v15, 8 }
  0x81   :  { %vm42_vm0 = vcmp.gt.s32.totalorder %v41_v11, 0  ;;  %v80_v46 = vand.u32 65535, %v289_v34  ;;  %v81_v48 = vshrl.u32 %v289_v34, 16 }
  0x82   :  { %v43_v13 = vsel %vm42_vm0, %v41_v11, 0 }
  0x83   :  { %v45_v14 = vand.u32 31, %v43_v13  ;;  %v287_v16 = vshrl.u32 %v43_v13, 5 }
  0x85   :  { %v46_v17 = vsub.s32 32, %v45_v14  ;;  %v48_v19 = vshll.u32 %v244_v18, %v45_v14  ;;  %v51_v21 = vshll.u32 %v245_v20, %v45_v14  ;;  %v54_v23 = vshll.u32 %v246_v22, %v45_v14 }
  0x86   :  { %v57_v25 = vshll.u32 %v247_v24, %v45_v14  ;;  %v60_v31 = vshll.u32 %v248_v29, %v45_v14  ;;  %vm63_vm1 = vcmp.lt.s32.totalorder %v287_v16, 1  ;;  %vm66_vm2 = vcmp.lt.s32.totalorder %v287_v16, 4 }
  0x87   :  { %v49_v26 = vshrl.u32 %v245_v20, %v46_v17  ;;  %v52_v27 = vshrl.u32 %v246_v22, %v46_v17  ;;  %v55_v28 = vshrl.u32 %v247_v24, %v46_v17  ;;  %v58_v30 = vshrl.u32 %v248_v29, %v46_v17 }
  0x88   :  { %v61_v33 = vshrl.u32 %v249_v32, %v46_v17  ;;  %vm65_vm3 = vcmp.lt.s32.totalorder %v287_v16, 3  ;;  %vm64_vm4 = vcmp.lt.s32.totalorder %v287_v16, 2  ;;  %v47_v11 = vshrl.u32 %v244_v18, %v46_v17 }
  0x89   :  { %v50_v35 = vor.u32 %v49_v26, %v48_v19  ;;  %v53_v36 = vor.u32 %v52_v27, %v51_v21  ;;  %v56_v37 = vor.u32 %v55_v28, %v54_v23  ;;  %v59_v38 = vor.u32 %v58_v30, %v57_v25 }
  0x8a   :  { %v62_v39 = vor.u32 %v61_v33, %v60_v31 }
  0x8b   :  { %v71_v40 = vsel %vm63_vm1, %v50_v35, %v53_v36  ;;  %v72_v41 = vsel %vm66_vm2, %v59_v38, 920167782  ;;  %v75_v42 = vsel %vm63_vm1, %v53_v36, %v56_v37  ;;  %v68_v7 = vsel %vm66_vm2, %v56_v37, 2102212464 }
  0x8c   :  { %v73_v43 = vsel %vm65_vm3, %v56_v37, %v72_v41  ;;  %v76_v44 = vsel %vm66_vm2, %v62_v39, 1326507024  ;;  %v67_v20 = vsel %vm63_vm1, %v47_v11, %v50_v35  ;;  %v69_v21 = vsel %vm65_vm3, %v53_v36, %v68_v7 }
  0x8d   :  { %v77_v45 = vsel %vm65_vm3, %v59_v38, %v76_v44  ;;  %v74_v47 = vsel %vm64_vm4, %v71_v40, %v73_v43  ;;  %v70_v18 = vsel %vm64_vm4, %v67_v20, %v69_v21  ;;  %vm174_vm1 = vweird.f32 %v281_v6 }
  0x8e   :  { %v78_v49 = vsel %vm64_vm4, %v75_v42, %v77_v45  ;;  %v104_v50 = vand.u32 65535, %v74_v47  ;;  %v105_v51 = vshrl.u32 %v74_v47, 16  ;;  %v124_v30 = vmul.u32 %v289_v34, %v70_v18 }
  0x8f   :  { %v82_v52 = vand.u32 65535, %v78_v49  ;;  %v83_v53 = vshrl.u32 %v78_v49, 16 }
  0x90   :  { %v107_v54 = vmul.u32 %v105_v51, %v80_v46  ;;  %v108_v55 = vmul.u32 %v104_v50, %v81_v48  ;;  %v106_v58 = vmul.u32 %v104_v50, %v80_v46  ;;  %v109_v62 = vmul.u32 %v105_v51, %v81_v48 }
  0x91   :  { %v85_v56 = vmul.u32 %v83_v53, %v80_v46  ;;  %v86_v57 = vmul.u32 %v82_v52, %v81_v48  ;;  %v84_v60 = vmul.u32 %v82_v52, %v80_v46  ;;  %v87_v63 = vmul.u32 %v83_v53, %v81_v48 }
  0x92   :  { %v110_v59 = vshll.u32 %v107_v54, 16  ;;  %v112_v0 = vshll.u32 %v108_v55, 16  ;;  %v111_v15 = vshrl.u32 %v107_v54, 16  ;;  %v113_v24 = vshrl.u32 %v108_v55, 16 }
  0x93   :  { %v88_v61 = vshll.u32 %v85_v56, 16  ;;  %v90_v3 = vshll.u32 %v86_v57, 16  ;;  %v89_v22 = vshrl.u32 %v85_v56, 16  ;;  %v91_v26 = vshrl.u32 %v86_v57, 16 }
  0x94   :  { %vm114_vm5 = vc.u32 %v106_v58, %v110_v59  ;;  %v116_v2 = vadd.s32 %v110_v59, %v106_v58 }
  0x95   :  { %vm92_vm6 = vc.u32 %v84_v60, %v88_v61  ;;  %v94_v4 = vadd.s32 %v88_v61, %v84_v60  ;;  %v115_v5 = vsel %vm114_vm5, 1, %v243_v1 }
  0x96   :  { %v93_v8 = vsel %vm92_vm6, 1, %v243_v1  ;;  %v117_v10 = vadd.s32 %v115_v5, %v109_v62  ;;  %vm118_vm7 = vc.u32 %v116_v2, %v112_v0 }
  0x97   :  { %v95_v12 = vadd.s32 %v93_v8, %v87_v63  ;;  %vm96_vm8 = vc.u32 %v94_v4, %v90_v3  ;;  %v119_v13 = vsel %vm118_vm7, 1, %v243_v1 }
  0x98   :  { %v97_v14 = vsel %vm96_vm8, 1, %v243_v1  ;;  %v121_v19 = vadd.s32 %v119_v13, %v117_v10  ;;  %v120_v1 = vadd.s32 %v116_v2, %v112_v0 }
  0x99   :  { %v99_v23 = vadd.s32 %v97_v14, %v95_v12 }
  0x9a   :  { %v122_v25 = vadd.s32 %v121_v19, %v111_v15 }
  0x9b   :  { %v100_v17 = vadd.s32 %v99_v23, %v89_v22 }
  0x9c   :  { %v123_v27 = vadd.s32 %v122_v25, %v113_v24 }
  0x9d   :  { %v101_v28 = vadd.s32 %v100_v17, %v91_v26 }
  0x9e   :  { %v127_v29 = vadd.s32 1, %v123_v27 }
  0x9f   :  { %vm126_vm9 = vc.u32 %v101_v28, %v120_v1  ;;  %v125_v42 = vadd.s32 %v120_v1, %v101_v28 }
  0xa0   :  { %v128_v31 = vsel %vm126_vm9, %v127_v29, %v123_v27 }
  0xa1   :  { %v129_v32 = vadd.s32 %v128_v31, %v124_v30 }
  0xa3   :  { %v130_v33 = vadd.s32 536870912, %v129_v32 }
  0xa5   :  { %v131_v35 = vshrl.u32 %v130_v33, 30 }
  0xa7   :  { %v132_v36 = vshll.u32 %v131_v35, 30  ;;  %v155_v55 = vsub.s32 4, %v131_v35 }
  0xa9   :  { %v133_v37 = vsub.s32 %v129_v32, %v132_v36  ;;  %v156_v60 = vsel %vm33_vm12, %v155_v55, %v131_v35 }
  0xaa   :  { %v158_v63 = vsel %vm32_vm13, 0, %v156_v60 }
  0xab   :  { %vm134_vm10 = vcmp.lt.s32.totalorder %v133_v37, 0  ;;  %v135_v38 = vsub.s32 0, %v133_v37  ;;  %v175_v5 = vadd.s32 3, %v158_v63 }
  0xad   :  { %v136_v39 = vsel %vm134_vm10, %v135_v38, %v133_v37  ;;  %v176_v11 = vand.u32 3, %v175_v5 }
  0xae   :  { %v137_v40 = vclz %v136_v39 }
  0xaf   :  { %vm178_vm14 = vcmp.eq.s32.totalorder %v176_v11, 0  ;;  %vm181_vm15 = vcmp.eq.s32.totalorder %v176_v11, 2  ;;  %vm177_vm0 = vcmp.lt.s32.totalorder %v176_v11, 2 }
  0xb0   :  { %v204_v41 = vadd.s32 4294967294, %v137_v40 }
  0xb2   :  { %vm205_vm11 = vcmp.lt.s32.totalorder %v204_v41, 0 }
  0xb3   :  { %v140_v16 = vsel %vm205_vm11, 0, %v204_v41 }
  0xb4   :  { %v141_v43 = vsub.s32 32, %v140_v16  ;;  %v145_v44 = vsub.s32 4294967266, %v140_v16  ;;  %v142_v45 = vshll.u32 %v133_v37, %v140_v16 }
  0xb6   :  { %v143_v46 = vshrl.u32 %v125_v42, %v141_v43  ;;  %v146_v34 = vadd.s32 127, %v145_v44 }
  0xb8   :  { %v144_v47 = vor.u32 %v143_v46, %v142_v45  ;;  %v147_v48 = vshll.u32 %v146_v34, 23 }
  0xba   :  { %v148_v49 = vor.u32 4788187, %v147_v48  ;;  %v151_v51 = vcvt.s32.f32 %v144_v47 }
  0xbc   :  { %v149_v50 = vand.u32 2147483647, %v148_v49 }
  0xbe   :  { %v152_v52 = vmul.f32 %v151_v51, %v149_v50 }
  0xc0   :  { %v153_v53 = vxor.u32 2147483648, %v152_v52 }
  0xc2   :  { %v154_v54 = vsel %vm33_vm12, %v153_v53, %v152_v52 }
  0xc3   :  { %v157_v56 = vsel %vm32_vm13, %v281_v6, %v154_v54 }
  0xc4   :  { %v159_v57 = vmul.f32 %v157_v56, %v157_v56 }
  0xc6   :  { %v160_v58 = vmul.f32 -0.001358992, %v159_v57  ;;  %v167_v59 = vmul.f32 -0.00019511016, %v159_v57 }
  0xc8   :  { %v161_v61 = vadd.f32 0.041655596, %v160_v58  ;;  %v168_v62 = vadd.f32 0.008332121, %v167_v59 }
  0xca   :  { %v162_v0 = vmul.f32 %v161_v61, %v159_v57  ;;  %v169_v2 = vmul.f32 %v168_v62, %v159_v57 }
  0xcc   :  { %v163_v3 = vadd.f32 -0.4999988, %v162_v0  ;;  %v170_v4 = vadd.f32 -0.16666654, %v169_v2 }
  0xce   :  { %v164_v7 = vmul.f32 %v163_v3, %v159_v57  ;;  %v171_v8 = vmul.f32 %v170_v4, %v159_v57 }
  0xd0   :  { %v165_v10 = vadd.f32 1.0, %v164_v7  ;;  %v172_v9 = vadd.f32 1.0, %v171_v8 }
  0xd2   :  { %v173_v12 = vmul.f32 %v172_v9, %v157_v56  ;;  %v182_v13 = vxor.u32 2147483648, %v165_v10 }
  0xd4   :  { %v179_v14 = vxor.u32 2147483648, %v173_v12  ;;  %v183_v19 = vsel %vm181_vm15, %v182_v13, %v173_v12 }
  0xd6   :  { %v180_v15 = vsel %vm178_vm14, %v165_v10, %v179_v14 }
  0xd7   :  { %v184_v20 = vsel %vm177_vm0, %v180_v15, %v183_v19 }
  0xd8   :  { %v185_v21 = vsel %vm174_vm1, nan, %v184_v20 }
  0xd9   :  { %186 = vst [vmem:[#allocation2] sm:$0xff] %v185_v21 }
  0xda   :  { %197 = dma.vmem_to_hbm [thread:$0]  %s193_s1, 128, %s195_s19, [#allocation3]  }
  0xdb   :  { %241 = dma.done.wait [#allocation3], 128  }
  0xdc   :  { %242 = vsyncadd [#allocation3], 4294967168 }
  0xdd   :  { %202 = vsyncpa [#allocation3], 1 }

</bundles_post_ra>
